<compile_context>
chip_gen: v7x
topology: tpu7x:2x2x1
jax: 0.10.0
libtpu: 0.0.40
codegen_flags: <defaults>
</compile_context>

<pallas_src>
import jax
import jax.numpy as jnp
from jax.experimental import pallas as pl
from jax.experimental.pallas import tpu as pltpu


def channel_attention_kernel(x_ref, w1_ref, w2_ref, o_ref):
    # x_ref: (W, B*C) lane-dense slab. sublane = spatial position w, lane = b*C + c.
    x = x_ref[...]                                   # keep input dtype; no full-slab cast

    # Adaptive avg/max pool over the spatial axis (sublane reduction).
    # Only the tiny pooled (1, B*C) vectors are promoted to f32.
    avg = jnp.mean(x, axis=0, keepdims=True).astype(jnp.float32)   # (1, B*C)
    mx = jnp.max(x, axis=0, keepdims=True).astype(jnp.float32)     # (1, B*C)

    # Shared MLP, both branches fused:
    #   stack avg/max -> (2, B*C); ONE matmul with the block-diagonal first-layer
    #   weight; ReLU; sum the two branch rows (linearity of the second layer);
    #   ONE matmul with the block-diagonal second-layer weight.
    pooled = jnp.concatenate([avg, mx], axis=0)                     # (2, B*C)
    h = jnp.maximum(
        jnp.dot(pooled, w1_ref[...], preferred_element_type=jnp.float32), 0.0)  # (2, B*H)
    h_sum = jnp.sum(h, axis=0, keepdims=True)                       # (1, B*H)
    logits = jnp.dot(h_sum, w2_ref[...], preferred_element_type=jnp.float32)    # (1, B*C)
    attn = jax.nn.sigmoid(logits)                                   # (1, B*C)

    # Broadcast attention over the spatial (sublane) axis and scale.
    # Full-width (128-lane) unmasked stores to a lane-dense output slab.
    o_ref[...] = (attn * x).astype(o_ref.dtype)


def _block_diag(m, n_blocks):
    """Tile matrix m along the diagonal n_blocks times (folds batch into lanes)."""
    r, c = m.shape
    out = jnp.zeros((n_blocks * r, n_blocks * c), m.dtype)
    for i in range(n_blocks):
        out = out.at[i * r:(i + 1) * r, i * c:(i + 1) * c].set(m)
    return out


def channel_attention(x, w1, w2):
    """x: (B, C, W); w1: (C, C//ratio); w2: (C//ratio, C) (Linear weights pre-transposed)."""
    B, C, W = x.shape
    H = w1.shape[1]
    BC, BH = B * C, B * H

    # ---- wrapper-side layout plumbing (outside the kernel) -------------------
    # Lane-dense slab: sublane = spatial position, lane = (batch, channel).
    x_t = jnp.transpose(x, (2, 0, 1)).reshape(W, BC)                # (W, B*C)
    # Fold the batch into the lane dim of the MLP with block-diagonal weights.
    # Tiny ((B*C, B*H) = 16 KiB f32); in a real model these are packed once.
    w1b = _block_diag(w1.astype(jnp.float32), B)                    # (B*C, B*H)
    w2b = _block_diag(w2.astype(jnp.float32), B)                    # (B*H, B*C)

    itemsize = x.dtype.itemsize
    cost = pl.CostEstimate(
        flops=2 * 2 * BC * BH + 2 * BH * BC + 4 * B * C * W,
        transcendentals=BC,                                         # sigmoid
        bytes_accessed=2 * x.size * itemsize + 4 * (w1b.size + w2b.size),
    )

    out_t = pl.pallas_call(
        channel_attention_kernel,
        out_shape=jax.ShapeDtypeStruct((W, BC), x.dtype),
        grid=(1,),
        in_specs=[
            pl.BlockSpec((W, BC), lambda i: (0, 0)),
            pl.BlockSpec((BC, BH), lambda i: (0, 0)),
            pl.BlockSpec((BH, BC), lambda i: (0, 0)),
        ],
        out_specs=pl.BlockSpec((W, BC), lambda i: (0, 0)),
        compiler_params=pltpu.CompilerParams(
            dimension_semantics=("parallel",)),                     # megacore-ready
        cost_estimate=cost,
    )(x_t, w1b, w2b)

    # Back to the PyTorch (B, C, W) layout.
    return jnp.transpose(out_t.reshape(W, B, C), (1, 2, 0))


def channel_attention_ref(x, w1, w2):
    # Pure-JAX reference mirroring the PyTorch forward exactly.
    avg = jnp.mean(x, axis=-1)
    mx = jnp.max(x, axis=-1)
    h_avg = jnp.maximum(avg @ w1, 0.0)
    h_max = jnp.maximum(mx @ w1, 0.0)
    attn = jax.nn.sigmoid(h_avg @ w2 + h_max @ w2)
    return attn[:, :, None] * x


if __name__ == "__main__":
    B = 2            # batch
    C = 64           # channels
    RATIO = 4
    H = C // RATIO   # hidden = 16
    W = 48           # forward hard-codes expand(-1, -1, 48)

    key = jax.random.PRNGKey(0)
    kx, k1, k2 = jax.random.split(key, 3)

    x = jax.random.normal(kx, (B, C, W), dtype=jnp.float32)
    # Deterministic synthetic weights (Linear(..., bias=False)), stored
    # pre-transposed relative to PyTorch's (out, in) convention.
    w1 = jax.random.normal(k1, (C, H), dtype=jnp.float32) / jnp.sqrt(C)
    w2 = jax.random.normal(k2, (H, C), dtype=jnp.float32) / jnp.sqrt(H)

    out = jax.block_until_ready(channel_attention(x, w1, w2))
    ref = channel_attention_ref(x, w1, w2)

    assert out.shape == (B, C, W)
    assert jnp.allclose(out, ref, atol=2e-5, rtol=2e-5), "mismatch vs reference"

    print("KERNEL_OK")
</pallas_src>

<mosaic_0001>
module attributes {stable_mosaic.version = 11 : i64} {
  func.func @channel_attention_kernel(%arg0: i32, %arg1: memref<48x128xf32, #tpu.memory_space<vmem>>, %arg2: memref<128x32xf32, #tpu.memory_space<vmem>>, %arg3: memref<32x128xf32, #tpu.memory_space<vmem>>, %arg4: memref<48x128xf32, #tpu.memory_space<vmem>>) attributes {dimension_semantics = [#tpu.dimension_semantics<parallel>], iteration_bounds = array<i64: 1>, scalar_prefetch = 0 : i64, scratch_operands = 0 : i64, tpu.core_type = #tpu.core_type<tc>, window_params = [{pipeline_mode = #tpu.pipeline_mode<synchronous>, transform_indices = @transform_0, window_bounds = array<i64: 48, 128>}, {pipeline_mode = #tpu.pipeline_mode<synchronous>, transform_indices = @transform_1, window_bounds = array<i64: 128, 32>}, {pipeline_mode = #tpu.pipeline_mode<synchronous>, transform_indices = @transform_2, window_bounds = array<i64: 32, 128>}, {pipeline_mode = #tpu.pipeline_mode<synchronous>, transform_indices = @transform_3, window_bounds = array<i64: 48, 128>}]} {
    %c0 = arith.constant 0 : index
    %c0_0 = arith.constant 0 : index
    %0 = vector.load %arg1[%c0, %c0_0] : memref<48x128xf32, #tpu.memory_space<vmem>>, vector<48x128xf32>
    %cst = arith.constant dense<0.000000e+00> : vector<128xf32>
    %1 = vector.multi_reduction <add>, %0, %cst [0] : vector<48x128xf32> to vector<128xf32>
    %2 = vector.shape_cast %1 : vector<128xf32> to vector<1x128xf32>
    %cst_1 = arith.constant 4.800000e+01 : f32
    %3 = vector.broadcast %cst_1 : f32 to vector<1x128xf32>
    %4 = arith.divf %2, %3 : vector<1x128xf32>
    %cst_2 = arith.constant dense<0xFF800000> : vector<128xf32>
    %5 = vector.multi_reduction <maximumf>, %0, %cst_2 [0] : vector<48x128xf32> to vector<128xf32>
    %6 = vector.shape_cast %5 : vector<128xf32> to vector<1x128xf32>
    %7 = tpu.concatenate %4, %6 in 0 : vector<1x128xf32>, vector<1x128xf32> -> vector<2x128xf32>
    %c0_3 = arith.constant 0 : index
    %c0_4 = arith.constant 0 : index
    %8 = vector.load %arg2[%c0_3, %c0_4] : memref<128x32xf32, #tpu.memory_space<vmem>>, vector<128x32xf32>
    %cst_5 = arith.constant dense<0.000000e+00> : vector<2x32xf32>
    %9 = tpu.matmul %7, %8, %cst_5 {dimension_numbers = #tpu.dot_dimension_numbers<[1], [0], [0], [1], [0, 0, 1, 1], [], []>} : vector<2x128xf32>, vector<128x32xf32>, vector<2x32xf32> -> vector<2x32xf32>
    %cst_6 = arith.constant 0.000000e+00 : f32
    %10 = vector.broadcast %cst_6 : f32 to vector<2x32xf32>
    %11 = arith.maximumf %9, %10 : vector<2x32xf32>
    %cst_7 = arith.constant dense<0.000000e+00> : vector<32xf32>
    %12 = vector.multi_reduction <add>, %11, %cst_7 [0] : vector<2x32xf32> to vector<32xf32>
    %13 = vector.shape_cast %12 : vector<32xf32> to vector<1x32xf32>
    %c0_8 = arith.constant 0 : index
    %c0_9 = arith.constant 0 : index
    %14 = vector.load %arg3[%c0_8, %c0_9] : memref<32x128xf32, #tpu.memory_space<vmem>>, vector<32x128xf32>
    %cst_10 = arith.constant dense<0.000000e+00> : vector<1x128xf32>
    %15 = tpu.matmul %13, %14, %cst_10 {dimension_numbers = #tpu.dot_dimension_numbers<[1], [0], [0], [1], [0, 0, 1, 1], [], []>} : vector<1x32xf32>, vector<32x128xf32>, vector<1x128xf32> -> vector<1x128xf32>
    %16 = arith.negf %15 : vector<1x128xf32>
    %17 = math.exp %16 : vector<1x128xf32>
    %cst_11 = arith.constant 1.000000e+00 : f32
    %18 = vector.broadcast %cst_11 : f32 to vector<1x128xf32>
    %19 = arith.addf %18, %17 : vector<1x128xf32>
    %20 = arith.divf %18, %19 : vector<1x128xf32>
    %21 = vector.broadcast %20 : vector<1x128xf32> to vector<48x128xf32>
    %22 = arith.mulf %21, %0 : vector<48x128xf32>
    %c0_12 = arith.constant 0 : index
    %c0_13 = arith.constant 0 : index
    %23 = vector.load %arg4[%c0_12, %c0_13] : memref<48x128xf32, #tpu.memory_space<vmem>>, vector<48x128xf32>
    tpu.vector_store %arg4[%c0_12, %c0_13], %22 {strides = array<i32>} : memref<48x128xf32, #tpu.memory_space<vmem>>, vector<48x128xf32>,
    return
  }
  func.func @transform_0(%arg0: i32) -> (i32, i32) {
    %c0_i32 = arith.constant 0 : i32
    %c0_i32_0 = arith.constant 0 : i32
    %c0_i32_1 = arith.constant 0 : i32
    return %c0_i32, %c0_i32_0 : i32, i32
  }
  func.func @transform_1(%arg0: i32) -> (i32, i32) {
    %c0_i32 = arith.constant 0 : i32
    %c0_i32_0 = arith.constant 0 : i32
    %c0_i32_1 = arith.constant 0 : i32
    return %c0_i32, %c0_i32_0 : i32, i32
  }
  func.func @transform_2(%arg0: i32) -> (i32, i32) {
    %c0_i32 = arith.constant 0 : i32
    %c0_i32_0 = arith.constant 0 : i32
    %c0_i32_1 = arith.constant 0 : i32
    return %c0_i32, %c0_i32_0 : i32, i32
  }
  func.func @transform_3(%arg0: i32) -> (i32, i32) {
    %c0_i32 = arith.constant 0 : i32
    %c0_i32_0 = arith.constant 0 : i32
    %c0_i32_1 = arith.constant 0 : i32
    return %c0_i32, %c0_i32_0 : i32, i32
  }
}

</mosaic_0001>

<bundles_post_ra>
// kernel: tpu_custom_call.1
= control target key start
LH: loop header
LB: loop body
LE: loop exit
PB: predicated region body
PF: predicated region fallthrough
CT: control target
= control target key end

     0   :  { %v392_v3 = vmov 0.0|0.0   ;;  %vm393_vm0 = vmmov 0   ;;  %v394_v6 = vmov 0.0   ;;  %s548_s0 = inlined_call_operand.vmem [shape: f32[48,128], index: 0, kind: input, shape index: {}]   ;;  %s549_s1 = inlined_call_operand.vmem [shape: f32[128,32], index: 1, kind: input, shape index: {}]   ;;  %s550_s2 = inlined_call_operand.vmem [shape: f32[32,128], index: 2, kind: input, shape index: {}]   ;;  %s551_s3 = inlined_call_operand.hbm [shape: f32[48,128], index: 3, kind: output, shape index: {}]  }
   0x1   :  { %v47_v0 = vld [vmem:[%s549_s1] sm:$0xff]  ;;  %v48_v1 = vld [vmem:[%s549_s1 + $0x8] sm:$0xff]  ;;  %v49_v2 = vld [vmem:[%s549_s1 + $0x10] sm:$0xff]  ;;  %328 = vmatprep.subr.bf16.mxu0 %v392_v3  ;;  %314 = vmatprep.mubr.msk.f32.mxu0 %vm393_vm0, %v394_v6 }
   0x2   :  { %v329_v4 = vpack.c.bf16 %v48_v1, %v47_v0  ;;  %v50_v5 = vld [vmem:[%s549_s1 + $0x18] sm:$0xff]  ;;  %352 = vmatprep.subr.bf16.mxu1 %v392_v3  ;;  %325 = vmatprep.mubr.msk.f32.mxu1 %vm393_vm0, %v394_v6  ;;  %v51_v8 = vld [vmem:[%s549_s1 + $0x20] sm:$0xff]  ;;  %v52_v9 = vld [vmem:[%s549_s1 + $0x28] sm:$0xff] }
   0x3   :  { %v332_v7 = vpack.c.bf16 %v50_v5, %v49_v2  ;;  %v442_v10 = vld [vmem:[%s548_s0] sm:$0xff]  ;;  %v447_v11 = vld [vmem:[%s548_s0 + $0x8] sm:$0xff]  ;;  %v452_v12 = vld [vmem:[%s548_s0 + $0x10] sm:$0xff]  ;;  %v335_v15 = vpack.c.bf16 %v52_v9, %v51_v8 }
   0x4   :  { %330 = vmatpush3.bf16.msra.mxu0 %v329_v4  ;;  %v457_v13 = vld [vmem:[%s548_s0 + $0x20] sm:$0xff]  ;;  %v21_v14 = vadd.f32 %v447_v11, %v442_v10  ;;  %v464_v16 = vld [vmem:[%s548_s0 + $0x18] sm:$0xff]  ;;  %v469_v17 = vld [vmem:[%s548_s0 + $0x28] sm:$0xff] }
   0x5   :  { %331 = vmatprep.subr.bf16.mxu0 %v392_v3  ;;  %v34_v18 = vmax.f32 %v442_v10, %v457_v13 }
   0x8   :  { %333 = vmatpush3.bf16.msra.mxu0 %v332_v7 }
   0x9   :  { %8 = vsyncpa [#allocation3], 0  ;;  %334 = vmatprep.subr.bf16.mxu0 %v392_v3  ;;  %v53_v19 = vld [vmem:[%s549_s1 + $0x30] sm:$0xff]  ;;  %v54_v20 = vld [vmem:[%s549_s1 + $0x38] sm:$0xff]  ;;  %v22_v21 = vadd.f32 %v21_v14, %v452_v12  ;;  %v35_v22 = vmax.f32 %v447_v11, %v469_v17  ;;  %v37_v23 = vmax.f32 %v452_v12, %v464_v16  ;;  %vm45_vm1 = vcmask 1040384  }
   0xa   :  { %v338_v26 = vpack.c.bf16 %v54_v20, %v53_v19  ;;  %v55_v27 = vld [vmem:[%s549_s1 + $0x40] sm:$0xff]  ;;  %v56_v28 = vld [vmem:[%s549_s1 + $0x48] sm:$0xff]  ;;  %v57_v34 = vld [vmem:[%s549_s1 + $0x50] sm:$0xff]  ;;  %vm134_vm2 = vcmask 254976   ;;  %vm146_vm3 = vcmask 261120   ;;  %v226_v19 = vlaneseq }
   0xb   :  { %v23_v24 = vadd.f32 %v22_v21, %v464_v16  ;;  %v36_v25 = vmax.f32 %v34_v18, %v35_v22  ;;  %v341_v33 = vpack.c.bf16 %v56_v28, %v55_v27  ;;  %v58_v35 = vld [vmem:[%s549_s1 + $0x58] sm:$0xff]  ;;  %v59_v41 = vld [vmem:[%s549_s1 + $0x60] sm:$0xff]  ;;  %v60_v42 = vld [vmem:[%s549_s1 + $0x68] sm:$0xff] }
   0xc   :  { %336 = vmatpush3.bf16.msra.mxu0 %v335_v15  ;;  %v344_v40 = vpack.c.bf16 %v58_v35, %v57_v34  ;;  %v347_v46 = vpack.c.bf16 %v60_v42, %v59_v41  ;;  %v61_v48 = vld [vmem:[%s549_s1 + $0x70] sm:$0xff]  ;;  %v62_v49 = vld [vmem:[%s549_s1 + $0x78] sm:$0xff]  ;;  %v142_v56 = vld [vmem:[%s550_s2] sm:$0xff]  ;;  %v227_v20 = vshrl.u32 %v226_v19, 7 }
   0xd   :  { %337 = vmatprep.subr.bf16.mxu0 %v392_v3  ;;  %v24_v29 = vadd.f32 %v23_v24, %v457_v13  ;;  %v38_v30 = vmax.f32 %v36_v25, %v37_v23  ;;  %v350_v52 = vpack.c.bf16 %v62_v49, %v61_v48  ;;  %v143_v57 = vld [vmem:[%s550_s2 + $0x8] sm:$0xff]  ;;  %v144_v59 = vld [vmem:[%s550_s2 + $0x10] sm:$0xff]  ;;  %v145_v60 = vld [vmem:[%s550_s2 + $0x18] sm:$0xff]  ;;  %s395_s2 = smov [#allocation2]  }
   0xe   :  { %v353_v58 = vpack.c.bf16 %v143_v57, %v142_v56  ;;  %v356_v61 = vpack.c.bf16 %v145_v60, %v144_v59  ;;  %v228_v21 = vsub.s32 0, %v227_v20  ;;  %s247_s8 = sshll.u32 %s395_s2, 4  ;;  %s248_s8 = int_to_ptr.vmem [resolvable:$true] %s247_s8 }
   0xf   :  { %v25_v31 = vadd.f32 %v24_v29, %v469_v17  ;;  %v39_v32 = vrot.slane %v38_v30, 4  ;;  %s368_s9 = scalar_lea.vmem %s248_s8, 768  ;;  %p373_p1 = scmp.lt.s32.totalorder %s248_s8, %s248_s8 }
  0x10   :  { %339 = vmatpush3.bf16.msra.mxu0 %v338_v26  ;;  %354 = vmatpush3.bf16.msra.mxu1 %v353_v58  ;;  %p369_p0 = scmp.ne.s32.totalorder %s248_s8, %s368_s9  ;;  %p374_p2 = scmp.lt.s32.totalorder %s368_s9, %s368_s9 }
  0x11   :  { %340 = vmatprep.subr.bf16.mxu0 %v392_v3  ;;  %v26_v36 = vrot.slane %v25_v31, 4  ;;  %v40_v37 = vmax.f32 %v38_v30, %v39_v32  ;;  %355 = vmatprep.subr.bf16.mxu1 %v392_v3 }
  0x12   :  { %p375_p3 = por %p374_p2, %p373_p1 }
  0x13   :  { %v27_v38 = vadd.f32 %v26_v36, %v25_v31  ;;  %v41_v39 = vrot.slane %v40_v37, 2 }
  0x14   :  { %342 = vmatpush3.bf16.msra.mxu0 %v341_v33  ;;  %357 = vmatpush3.bf16.msra.mxu1 %v356_v61  ;;  %p376_p4 = pnand %p375_p3, %p369_p0 }
  0x15   :  { %343 = vmatprep.subr.bf16.mxu0 %v392_v3  ;;  %v28_v43 = vrot.slane %v27_v38, 2  ;;  %v42_v44 = vmax.f32 %v40_v37, %v41_v39 }
  0x17   :  { %v29_v45 = vadd.f32 %v28_v43, %v27_v38  ;;  %v43_v47 = vrot.slane %v42_v44, 1 }
  0x18   :  { %345 = vmatpush3.bf16.msra.mxu0 %v344_v40 }
  0x19   :  { %346 = vmatprep.subr.bf16.mxu0 %v392_v3  ;;  %v30_v50 = vrot.slane %v29_v45, 1  ;;  %v44_v53 = vmax.f32 %v42_v44, %v43_v47 }
  0x1b   :  { %v31_v51 = vadd.f32 %v30_v50, %v29_v45 }
  0x1c   :  { %348 = vmatpush3.bf16.msra.mxu0 %v347_v46 }
  0x1d   :  { %349 = vmatprep.subr.bf16.mxu0 %v392_v3  ;;  %v33_v54 = vmul.f32 0.020833334, %v31_v51 }
  0x1f   :  { %v46_v55 = vsel %vm45_vm1, %v33_v54, %v44_v53 }
  0x20   :  { %351 = vmatpush3.bf16.msra.mxu0 %v350_v52 }
  0x23   :  { %315 = vmatmul.mubr.f32.vlgmr.msra.gmra.mrb[0].mxu0 %v46_v55 }
  0xf6   :  { %v129_v62 = vpop.f32.mrb[0].mxu0 }
  0xf7   :  { %v133_v63 = vmax.f32 %v129_v62, 0.0  ;;  %v316_v0 = vpop.f32.mrb[1].mxu0 }
  0xf9   :  { %v135_v1 = vsel %vm134_vm2, %v133_v63, 0.0 }
  0xfa   :  { %v136_v2 = vrot.slane %v135_v1, 4 }
  0xfc   :  { %v137_v4 = vadd.f32 %v136_v2, %v135_v1 }
  0xfe   :  { %v138_v5 = vrot.slane %v137_v4, 2 }
 0x100   :  { %v139_v6 = vadd.f32 %v138_v5, %v137_v4 }
 0x102   :  { %v140_v3 = vrot.slane %v139_v6, 1 }
 0x104   :  { %v141_v7 = vadd.f32 %v140_v3, %v139_v6 }
 0x106   :  { %326 = vmatmul.mubr.msk.f32.vlgmr.msra.gmra.mrb[0].mxu1 %vm146_vm3, %v141_v7 }
 0x1d9   :  { %v216_v8 = vpop.f32.mrb[0].mxu1 }
 0x1da   :  { %v259_v9 = vmul.f32 -1.442695, %v216_v8  ;;  %v327_v14 = vpop.f32.mrb[1].mxu1 }
 0x1dc   :  { %364 = vpow2.f32 %v259_v9 }
 0x1e6   :  { %v365_v15 = vpop.eup %364 }
 0x1e7   :  { %v223_v18 = vadd.f32 1.0, %v365_v15 }
 0x1e9   :  { %366 = vrcp.f32 %v223_v18 }
 0x1f3   :  { %v367_v22 = vpop.eup %366 }
 0x1f4   :  { %v229_v23 = vrot.slane %v367_v22, %v228_v21 }
 0x1f6   :  { %v230_v24 = vmul.f32 %v229_v23, %v442_v10  ;;  %v231_v25 = vmul.f32 %v229_v23, %v447_v11  ;;  %v232_v26 = vmul.f32 %v229_v23, %v452_v12  ;;  %v233_v27 = vmul.f32 %v229_v23, %v464_v16 }
 0x1f7   :  { %v234_v28 = vmul.f32 %v229_v23, %v457_v13  ;;  %v235_v29 = vmul.f32 %v229_v23, %v469_v17 }
 0x1f8   :  { %236 = vst [vmem:[#allocation2] sm:$0xff] %v230_v24  ;;  %237 = vst [vmem:[#allocation2 + $0x8] sm:$0xff] %v231_v25 }
 0x1f9   :  { %238 = vst [vmem:[#allocation2 + $0x10] sm:$0xff] %v232_v26  ;;  %239 = vst [vmem:[#allocation2 + $0x18] sm:$0xff] %v233_v27 }
 0x1fa   :  { %240 = vst [vmem:[#allocation2 + $0x20] sm:$0xff] %v234_v28  ;;  %241 = vst [vmem:[#allocation2 + $0x28] sm:$0xff] %v235_v29 }
 0x1fb   :  { %379 = shalt.err (!%p376_p4)
}
 0x1fc   :  { %s380_s12 = scalar_lea.hbm %s551_s3, 768 }
 0x1fd   :  { %p381_p5 = scmp.ne.s32.totalorder %s551_s3, %s380_s12  ;;  %p384_p6 = scmp.lt.u32.totalorder %s380_s12, %s551_s3 }
 0x1ff   :  { %p386_p7 = pnand %p384_p6, %p381_p5 }
 0x201   :  { %389 = shalt.err (!%p386_p7)
}
 0x202   :  { %s396_s16 = smov 128   ;;  %s397_s17 = smov 8  }
 0x203   :  { %253 = dma.vmem_to_hbm [thread:$0]  %s248_s8, 768, %s551_s3, [#allocation3], %s396_s16, %s396_s16, %s397_s17  }
 0x204   :  { %390 = dma.done.wait [#allocation3], 768  }
 0x205   :  { %391 = vsyncadd [#allocation3], 4294966528 }
 0x206   :  { %257 = vsyncpa [#allocation3], 1 }

</bundles_post_ra>
